<compile_context>
chip_gen: v7x
topology: tpu7x:2x2x1
jax: 0.10.0
libtpu: 0.0.40
codegen_flags: <defaults>
</compile_context>

<pallas_src>
import functools

import jax
import jax.numpy as jnp
from jax.experimental import pallas as pl
from jax.experimental.pallas import tpu as pltpu

LANE = 128
DEFAULT_BATCH_TILE = 128


def _round_up(n, m):
    return ((n + m - 1) // m) * m


# ----------------------------------------------------------------------------
# Kernel: one batch tile through the whole 3-layer MLP.
#   x_ref : (TB, in_dim)   f32   (lane dim == full array dim, unpadded)
#   w_ref : (3, HP, HP)    bf16  stacked zero-padded weights
#   b_ref : (3, HP)        f32   stacked zero-padded biases
#   o_ref : (TB, out_dim)  f32
# Zero-padded weight rows/cols make the padded hidden lanes exact zeros
# through ReLU + matmul, so no masking is needed.
# ----------------------------------------------------------------------------
def decoder_kernel(x_ref, w_ref, b_ref, o_ref, *, in_dim, out_dim):
    b = b_ref[...]                                   # (3, HP) f32
    x = x_ref[...].astype(jnp.bfloat16)              # (TB, in_dim)

    # fc1 + relu : bf16 MXU matmul, f32 accumulation / elementwise
    h = jnp.dot(x, w_ref[0][:in_dim, :], preferred_element_type=jnp.float32)
    h = jnp.maximum(h + b[0:1, :], 0.0)
    # fc2 + relu
    h = jnp.dot(h.astype(jnp.bfloat16), w_ref[1],
                preferred_element_type=jnp.float32)
    h = jnp.maximum(h + b[1:2, :], 0.0)
    # fc3 (no activation)
    out = jnp.dot(h.astype(jnp.bfloat16), w_ref[2],
                  preferred_element_type=jnp.float32) + b[2:3, :]

    o_ref[...] = out[:, :out_dim].astype(o_ref.dtype)


# ----------------------------------------------------------------------------
# One-time parameter preparation: stack + zero-pad weights/biases.
# Returns (w_stack, b_stack, dims) where dims are PLAIN PYTHON INTS that must
# be passed as static args (never inside a traced pytree).
# ----------------------------------------------------------------------------
def prepare_decoder_params(params):
    in_dim, hidden_dim = params["w1"].shape
    out_dim = params["w3"].shape[1]
    hp = _round_up(max(in_dim, hidden_dim, out_dim), LANE)

    w_stack = jnp.zeros((3, hp, hp), jnp.bfloat16)
    w_stack = w_stack.at[0, :in_dim, :hidden_dim].set(
        params["w1"].astype(jnp.bfloat16))
    w_stack = w_stack.at[1, :hidden_dim, :hidden_dim].set(
        params["w2"].astype(jnp.bfloat16))
    w_stack = w_stack.at[2, :hidden_dim, :out_dim].set(
        params["w3"].astype(jnp.bfloat16))

    b_stack = jnp.zeros((3, hp), jnp.float32)
    b_stack = b_stack.at[0, :hidden_dim].set(
        params["b1"].reshape(-1).astype(jnp.float32))
    b_stack = b_stack.at[1, :hidden_dim].set(
        params["b2"].reshape(-1).astype(jnp.float32))
    b_stack = b_stack.at[2, :out_dim].set(
        params["b3"].reshape(-1).astype(jnp.float32))

    dims = {"in_dim": in_dim, "hidden_dim": hidden_dim, "out_dim": out_dim}
    return w_stack, b_stack, dims


# ----------------------------------------------------------------------------
# Wrapper: batched grid over rows, fused constant params VMEM-resident.
# ----------------------------------------------------------------------------
@functools.partial(
    jax.jit,
    static_argnames=("in_dim", "hidden_dim", "out_dim", "batch_tile"))
def decoder_forward(x, w_stack, b_stack, *, in_dim, hidden_dim, out_dim,
                    batch_tile=DEFAULT_BATCH_TILE):
    assert x.shape[1] == in_dim
    B = x.shape[0]

    # Tile the batch.  Default 128 keeps grid >= 2 for B >= 256 so the
    # "parallel" axis shards across both v7x TensorCores; shrink the tile for
    # tiny batches so we never over-pad.
    bt = min(batch_tile, _round_up(B, 8))
    Bp = _round_up(B, bt)
    x_in = x if Bp == B else jnp.pad(x, ((0, Bp - B), (0, 0)))

    grid = (Bp // bt,)
    kernel = functools.partial(decoder_kernel, in_dim=in_dim, out_dim=out_dim)

    # Realistic (unpadded-dim) cost estimate — advisory only.
    flops = 2 * B * (in_dim * hidden_dim + hidden_dim * hidden_dim
                     + hidden_dim * out_dim)
    bytes_accessed = (x.size * 4 + w_stack.size * 2 + b_stack.size * 4
                      + B * out_dim * 4)

    out = pl.pallas_call(
        kernel,
        out_shape=jax.ShapeDtypeStruct((Bp, out_dim), jnp.float32),
        grid=grid,
        in_specs=[
            pl.BlockSpec((bt, in_dim), lambda i: (i, 0)),
            pl.BlockSpec(w_stack.shape, lambda i: (0, 0, 0)),   # constant: DMA'd once
            pl.BlockSpec(b_stack.shape, lambda i: (0, 0)),      # constant: DMA'd once
        ],
        out_specs=pl.BlockSpec((bt, out_dim), lambda i: (i, 0)),
        compiler_params=pltpu.CompilerParams(
            dimension_semantics=("parallel",),
            vmem_limit_bytes=32 * 1024 * 1024,
        ),
        cost_estimate=pl.CostEstimate(
            flops=flops, transcendentals=0, bytes_accessed=bytes_accessed),
    )(x_in, w_stack, b_stack)

    return out if Bp == B else out[:B]


# ----------------------------------------------------------------------------
# Deterministic synthetic init (PyTorch nn.Linear default: U(-1/sqrt(fan_in),.))
# ----------------------------------------------------------------------------
def init_decoder_params(key, input_dim1, hidden_dim, output_dim):
    ks = jax.random.split(key, 6)

    def lin(kw, kb, fan_in, fan_out):
        bound = 1.0 / float(fan_in) ** 0.5
        w = jax.random.uniform(kw, (fan_in, fan_out), jnp.float32, -bound, bound)
        b = jax.random.uniform(kb, (1, fan_out), jnp.float32, -bound, bound)
        return w, b

    w1, b1 = lin(ks[0], ks[1], input_dim1, hidden_dim)
    w2, b2 = lin(ks[2], ks[3], hidden_dim, hidden_dim)
    w3, b3 = lin(ks[4], ks[5], hidden_dim, output_dim)
    return {"w1": w1, "b1": b1, "w2": w2, "b2": b2, "w3": w3, "b3": b3}


# ----------------------------------------------------------------------------
# References
# ----------------------------------------------------------------------------
def decoder_ref_f32(x, p):
    h = jnp.maximum(x @ p["w1"] + p["b1"], 0.0)
    h = jnp.maximum(h @ p["w2"] + p["b2"], 0.0)
    return h @ p["w3"] + p["b3"]


def decoder_ref_bf16(x, p):
    bf = jnp.bfloat16
    h = jnp.dot(x.astype(bf), p["w1"].astype(bf),
                preferred_element_type=jnp.float32) + p["b1"]
    h = jnp.maximum(h, 0.0)
    h = jnp.dot(h.astype(bf), p["w2"].astype(bf),
                preferred_element_type=jnp.float32) + p["b2"]
    h = jnp.maximum(h, 0.0)
    return jnp.dot(h.astype(bf), p["w3"].astype(bf),
                   preferred_element_type=jnp.float32) + p["b3"]


if __name__ == "__main__":
    key = jax.random.PRNGKey(0)
    k_x, k_p = jax.random.split(key)

    # ODITS decoder dims; batch large enough to fill an MXU tile per grid step.
    B, input_dim1, hidden_dim, output_dim = 256, 16, 32, 8
    x = jax.random.normal(k_x, (B, input_dim1), jnp.float32)
    params = init_decoder_params(k_p, input_dim1, hidden_dim, output_dim)
    w_stack, b_stack, dims = prepare_decoder_params(params)

    out = decoder_forward(x, w_stack, b_stack, **dims)
    out = jax.block_until_ready(out)
    assert out.shape == (B, output_dim)

    # Exact-arithmetic check against a bf16-matmul reference.
    ref_bf16 = decoder_ref_bf16(x, params)
    assert jnp.allclose(out, ref_bf16, atol=2e-3, rtol=2e-3), \
        "mismatch vs bf16 reference"

    # Semantic check against the pure-f32 PyTorch-equivalent forward.
    ref_f32 = decoder_ref_f32(x, params)
    assert jnp.allclose(out, ref_f32, atol=5e-2, rtol=5e-2), \
        "mismatch vs f32 reference"

    # Ragged-batch path (exercises the static batch pad/slice branch).
    x_small = jax.random.normal(k_x, (5, input_dim1), jnp.float32)
    out_small = jax.block_until_ready(
        decoder_forward(x_small, w_stack, b_stack, **dims))
    assert out_small.shape == (5, output_dim)
    assert jnp.allclose(out_small, decoder_ref_f32(x_small, params),
                        atol=5e-2, rtol=5e-2), "mismatch on ragged batch"

    print("KERNEL_OK")
</pallas_src>

<mosaic_0001>
module attributes {stable_mosaic.version = 11 : i64} {
  func.func @decoder_kernel(%arg0: i32, %arg1: memref<128x16xf32, #tpu.memory_space<vmem>>, %arg2: memref<3x128x128xbf16, #tpu.memory_space<vmem>>, %arg3: memref<3x128xf32, #tpu.memory_space<vmem>>, %arg4: memref<128x8xf32, #tpu.memory_space<vmem>>) attributes {dimension_semantics = [#tpu.dimension_semantics<parallel>], iteration_bounds = array<i64: 2>, scalar_prefetch = 0 : i64, scratch_operands = 0 : i64, tpu.core_type = #tpu.core_type<tc>, window_params = [{transform_indices = @transform_0, window_bounds = array<i64: 128, 16>}, {pipeline_mode = #tpu.pipeline_mode<synchronous>, transform_indices = @transform_1, window_bounds = array<i64: 3, 128, 128>}, {pipeline_mode = #tpu.pipeline_mode<synchronous>, transform_indices = @transform_2, window_bounds = array<i64: 3, 128>}, {transform_indices = @transform_3, window_bounds = array<i64: 128, 8>}]} {
    %c0 = arith.constant 0 : index
    %c0_0 = arith.constant 0 : index
    %0 = vector.load %arg3[%c0, %c0_0] : memref<3x128xf32, #tpu.memory_space<vmem>>, vector<3x128xf32>
    %c0_1 = arith.constant 0 : index
    %c0_2 = arith.constant 0 : index
    %1 = vector.load %arg1[%c0_1, %c0_2] : memref<128x16xf32, #tpu.memory_space<vmem>>, vector<128x16xf32>
    %2 = arith.truncf %1 : vector<128x16xf32> to vector<128x16xbf16>
    %c0_3 = arith.constant 0 : index
    %c0_4 = arith.constant 0 : index
    %c0_5 = arith.constant 0 : index
    %3 = vector.load %arg2[%c0_3, %c0_4, %c0_5] : memref<3x128x128xbf16, #tpu.memory_space<vmem>>, vector<1x128x128xbf16>
    %4 = vector.shape_cast %3 : vector<1x128x128xbf16> to vector<128x128xbf16>
    %5 = vector.extract_strided_slice %4 {offsets = [0, 0], sizes = [16, 128], strides = [1, 1]} : vector<128x128xbf16> to vector<16x128xbf16>
    %cst = arith.constant dense<0.000000e+00> : vector<128x128xf32>
    %6 = tpu.matmul %2, %5, %cst {dimension_numbers = #tpu.dot_dimension_numbers<[1], [0], [0], [1], [0, 0, 1, 1], [], []>} : vector<128x16xbf16>, vector<16x128xbf16>, vector<128x128xf32> -> vector<128x128xf32>
    %7 = vector.extract_strided_slice %0 {offsets = [0, 0], sizes = [1, 128], strides = [1, 1]} : vector<3x128xf32> to vector<1x128xf32>
    %8 = vector.broadcast %7 : vector<1x128xf32> to vector<128x128xf32>
    %9 = arith.addf %6, %8 : vector<128x128xf32>
    %cst_6 = arith.constant 0.000000e+00 : f32
    %10 = vector.broadcast %cst_6 : f32 to vector<128x128xf32>
    %11 = arith.maximumf %9, %10 : vector<128x128xf32>
    %12 = arith.truncf %11 : vector<128x128xf32> to vector<128x128xbf16>
    %c1 = arith.constant 1 : index
    %c0_7 = arith.constant 0 : index
    %c0_8 = arith.constant 0 : index
    %13 = vector.load %arg2[%c1, %c0_7, %c0_8] : memref<3x128x128xbf16, #tpu.memory_space<vmem>>, vector<1x128x128xbf16>
    %14 = vector.shape_cast %13 : vector<1x128x128xbf16> to vector<128x128xbf16>
    %cst_9 = arith.constant dense<0.000000e+00> : vector<128x128xf32>
    %15 = tpu.matmul %12, %14, %cst_9 {dimension_numbers = #tpu.dot_dimension_numbers<[1], [0], [0], [1], [0, 0, 1, 1], [], []>} : vector<128x128xbf16>, vector<128x128xbf16>, vector<128x128xf32> -> vector<128x128xf32>
    %16 = vector.extract_strided_slice %0 {offsets = [1, 0], sizes = [1, 128], strides = [1, 1]} : vector<3x128xf32> to vector<1x128xf32>
    %17 = vector.broadcast %16 : vector<1x128xf32> to vector<128x128xf32>
    %18 = arith.addf %15, %17 : vector<128x128xf32>
    %cst_10 = arith.constant 0.000000e+00 : f32
    %19 = vector.broadcast %cst_10 : f32 to vector<128x128xf32>
    %20 = arith.maximumf %18, %19 : vector<128x128xf32>
    %21 = arith.truncf %20 : vector<128x128xf32> to vector<128x128xbf16>
    %c2 = arith.constant 2 : index
    %c0_11 = arith.constant 0 : index
    %c0_12 = arith.constant 0 : index
    %22 = vector.load %arg2[%c2, %c0_11, %c0_12] : memref<3x128x128xbf16, #tpu.memory_space<vmem>>, vector<1x128x128xbf16>
    %23 = vector.shape_cast %22 : vector<1x128x128xbf16> to vector<128x128xbf16>
    %cst_13 = arith.constant dense<0.000000e+00> : vector<128x128xf32>
    %24 = tpu.matmul %21, %23, %cst_13 {dimension_numbers = #tpu.dot_dimension_numbers<[1], [0], [0], [1], [0, 0, 1, 1], [], []>} : vector<128x128xbf16>, vector<128x128xbf16>, vector<128x128xf32> -> vector<128x128xf32>
    %25 = vector.extract_strided_slice %0 {offsets = [2, 0], sizes = [1, 128], strides = [1, 1]} : vector<3x128xf32> to vector<1x128xf32>
    %26 = vector.broadcast %25 : vector<1x128xf32> to vector<128x128xf32>
    %27 = arith.addf %24, %26 : vector<128x128xf32>
    %28 = vector.extract_strided_slice %27 {offsets = [0, 0], sizes = [128, 8], strides = [1, 1]} : vector<128x128xf32> to vector<128x8xf32>
    %c0_14 = arith.constant 0 : index
    %c0_15 = arith.constant 0 : index
    %29 = vector.load %arg4[%c0_14, %c0_15] : memref<128x8xf32, #tpu.memory_space<vmem>>, vector<128x8xf32>
    tpu.vector_store %arg4[%c0_14, %c0_15], %28 {strides = array<i32>} : memref<128x8xf32, #tpu.memory_space<vmem>>, vector<128x8xf32>,
    return
  }
  func.func @transform_0(%arg0: i32) -> (i32, i32) {
    %c0_i32 = arith.constant 0 : i32
    %c0_i32_0 = arith.constant 0 : i32
    return %arg0, %c0_i32 : i32, i32
  }
  func.func @transform_1(%arg0: i32) -> (i32, i32, i32) {
    %c0_i32 = arith.constant 0 : i32
    %c0_i32_0 = arith.constant 0 : i32
    %c0_i32_1 = arith.constant 0 : i32
    %c0_i32_2 = arith.constant 0 : i32
    return %c0_i32, %c0_i32_0, %c0_i32_1 : i32, i32, i32
  }
  func.func @transform_2(%arg0: i32) -> (i32, i32) {
    %c0_i32 = arith.constant 0 : i32
    %c0_i32_0 = arith.constant 0 : i32
    %c0_i32_1 = arith.constant 0 : i32
    return %c0_i32, %c0_i32_0 : i32, i32
  }
  func.func @transform_3(%arg0: i32) -> (i32, i32) {
    %c0_i32 = arith.constant 0 : i32
    %c0_i32_0 = arith.constant 0 : i32
    return %arg0, %c0_i32 : i32, i32
  }
}

</mosaic_0001>

<bundles_post_ra>
// kernel: decoder_forward.1
= control target key start
LH: loop header
LB: loop body
LE: loop exit
PB: predicated region body
PF: predicated region fallthrough
CT: control target
= control target key end

     0   :  { %s1031_s12 = smov 0   ;;  %s1179_s0 = inlined_call_operand.vmem [shape: f32[256,16], index: 0, kind: input, shape index: {}]   ;;  %s1180_s1 = inlined_call_operand.vmem [shape: bf16[3,128,128], index: 1, kind: input, shape index: {}]   ;;  %s1181_s2 = inlined_call_operand.vmem [shape: f32[3,128], index: 2, kind: input, shape index: {}]   ;;  %s1182_s3 = inlined_call_operand.vmem [shape: f32[256,8], index: 3, kind: output, shape index: {}]  }
   0x1 LB: > { %s787_s13 = sadd.s32 4294967295, %s1009_s12   ;;  %p791_p0 = scmp.ge.s32.totalorder %s1009_s12, 1  ;;  %s1009_s12 = sphi %s1031_s12, %s13_s12  }
   0x2   : > { %p138_p1 = scmp.lt.s32.totalorder %s1009_s12, 3 }
   0x4   : > { %p139_p2 = pnand %p791_p0, %p138_p1 }
   0x5   : > { %v986_v0 = vld [vmem:[%s1180_s1] sm:$0xff] (!%p139_p2)   ;;  %s792_s16 = sshll.u32 (!%p139_p2), %s787_s13, 4  ;;  %v988_v2 = vld [vmem:[%s1180_s1 + $0x48] sm:$0xff] (!%p139_p2)   ;;  %v989_v3 = vld [vmem:[%s1180_s1 + $0x50] sm:$0xff] (!%p139_p2)   ;;  %vm212_vm0 = vcmask (!%p139_p2), 130048   ;;  %v202_v39 = vlaneseq (!%p139_p2)  ;;  %vm714_vm1 = vcmask (!%p139_p2), 64512  }
   0x6   : > { %142 = sbr.rel (%p139_p2) target bundleno = 706 (0x2c2), region = 32  ;;  %p163_p3 = scmp.lt.s32.totalorder (!%p139_p2), %s792_s16, 31  ;;  %896 = vmatprep.subr.bf16.mxu0 (!%p139_p2), %v986_v0  ;;  %v987_v1 = vld [vmem:[%s1180_s1 + $0x40] sm:$0xff] (!%p139_p2)   ;;  %v990_v13 = vld [vmem:[%s1180_s1 + $0x58] sm:$0xff] (!%p139_p2)   ;;  %v992_v21 = vld [vmem:[%s1180_s1 + $0x68] sm:$0xff] (!%p139_p2)  }
   0x7   : > { %897 = vmatpush3.bf16.msra.mxu0 (!%p139_p2), %v986_v0  ;;  %914 = vmatprep.subr.bf16.mxu1 (!%p139_p2), %v987_v1  ;;  %v991_v18 = vld [vmem:[%s1180_s1 + $0x60] sm:$0xff] (!%p139_p2)   ;;  %v993_v31 = vld [vmem:[%s1180_s1 + $0x70] sm:$0xff] (!%p139_p2)   ;;  %v994_v32 = vld [vmem:[%s1180_s1 + $0x78] sm:$0xff] (!%p139_p2)   ;;  %v1118_v40 = vshrl.u32 (!%p139_p2), %v202_v39, 7 }
   0x8   : > { %915 = vmatpush3.bf16.msra.mxu1 (!%p139_p2), %v987_v1  ;;  %v995_v33 = vld [vmem:[%s1180_s1 + $0x80] sm:$0xff] (!%p139_p2)   ;;  %v996_v34 = vld [vmem:[%s1180_s1 + $0x88] sm:$0xff] (!%p139_p2)   ;;  %v997_v35 = vld [vmem:[%s1180_s1 + $0x90] sm:$0xff] (!%p139_p2)  }
   0x9   : > { %916 = vmatprep.subr.bf16.mxu1 (!%p139_p2), %v988_v2  ;;  %946 = vmatprep.subr.bf16.mxu0 (!%p139_p2), %v995_v33  ;;  %v998_v36 = vld [vmem:[%s1180_s1 + $0x98] sm:$0xff] (!%p139_p2)   ;;  %v999_v37 = vld [vmem:[%s1180_s1 + $0xa0] sm:$0xff] (!%p139_p2)   ;;  %v1000_v38 = vld [vmem:[%s1180_s1 + $0xa8] sm:$0xff] (!%p139_p2)   ;;  %v204_v41 = vsub.s32 (!%p139_p2), 0, %v1118_v40 }
   0xa   : > { %v1124_v42 = vld [vmem:[%s1181_s2] sm:$0x7] (!%p139_p2) }
   0xb   : > { %v205_v43 = vrot.slane (!%p139_p2), %v1124_v42, %v204_v41 }
   0xc   : > { %917 = vmatpush3.bf16.msra.mxu1 (!%p139_p2), %v988_v2 }
   0xd   : > { %s1184_s16 = smov (!%p163_p3, %s792_s16), 31  ;;  %918 = vmatprep.subr.bf16.mxu1 %v989_v3 }
   0xe   : > { %s793_s21 = sshll.u32 %s1184_s16, 3 }
   0xf   : > { %s1056_s24 = scalar_lea.vmem %s1179_s0, %s793_s21  ;;  %s1142_s6 = scalar_lea.vmem %s1182_s3, %s793_s21 }
  0x10   : > { %v176_v4 = vld [vmem:[%s1056_s24] sm:$0xff]  ;;  %v177_v5 = vld [vmem:[%s1056_s24 + $0x8] sm:$0xff]  ;;  %v178_v6 = vld [vmem:[%s1056_s24 + $0x10] sm:$0xff]  ;;  %919 = vmatpush3.bf16.msra.mxu1 %v989_v3 }
  0x11   : > { %v192_v7 = vpack.c.bf16 %v177_v5, %v176_v4  ;;  %v179_v8 = vld [vmem:[%s1056_s24 + $0x18] sm:$0xff]  ;;  %v180_v9 = vld [vmem:[%s1056_s24 + $0x20] sm:$0xff]  ;;  %v181_v10 = vld [vmem:[%s1056_s24 + $0x28] sm:$0xff]  ;;  %920 = vmatprep.subr.bf16.mxu1 %v990_v13 }
  0x12   : > { %v193_v11 = vpack.c.bf16 %v179_v8, %v178_v6  ;;  %v194_v12 = vpack.c.bf16 %v181_v10, %v180_v9  ;;  %v182_v14 = vld [vmem:[%s1056_s24 + $0x30] sm:$0xff]  ;;  %v183_v15 = vld [vmem:[%s1056_s24 + $0x38] sm:$0xff]  ;;  %v184_v16 = vld [vmem:[%s1056_s24 + $0x40] sm:$0xff] }
  0x13   : > { %898 = vmatprep.mubr.msk.bf16.mxu0 %vm212_vm0, %v192_v7  ;;  %v185_v17 = vld [vmem:[%s1056_s24 + $0x48] sm:$0xff]  ;;  %v195_v19 = vpack.c.bf16 %v183_v15, %v182_v14  ;;  %v186_v22 = vld [vmem:[%s1056_s24 + $0x50] sm:$0xff]  ;;  %v187_v23 = vld [vmem:[%s1056_s24 + $0x58] sm:$0xff] }
  0x14   : > { %899 = vmatmul.mubr.msk.bf16.vlgmr.msra.gmra.mrb[0].mxu0 %vm212_vm0, %v193_v11  ;;  %v196_v20 = vpack.c.bf16 %v185_v17, %v184_v16  ;;  %921 = vmatpush3.bf16.msra.mxu1 %v990_v13  ;;  %v188_v24 = vld [vmem:[%s1056_s24 + $0x60] sm:$0xff]  ;;  %v189_v25 = vld [vmem:[%s1056_s24 + $0x68] sm:$0xff]  ;;  %v197_v26 = vpack.c.bf16 %v187_v23, %v186_v22  ;;  %v190_v28 = vld [vmem:[%s1056_s24 + $0x70] sm:$0xff] }
  0x15   : > { %902 = vmatprep.mubr.msk.bf16.mxu0 %vm212_vm0, %v194_v12  ;;  %922 = vmatprep.subr.bf16.mxu1 %v991_v18  ;;  %v198_v27 = vpack.c.bf16 %v189_v25, %v188_v24  ;;  %v191_v29 = vld [vmem:[%s1056_s24 + $0x78] sm:$0xff] }
  0x16   : > { %v199_v30 = vpack.c.bf16 %v191_v29, %v190_v28  ;;  %947 = vmatpush3.bf16.msra.mxu0 %v995_v33 }
  0x17   : > { %948 = vmatprep.subr.bf16.mxu0 %v996_v34 }
  0x18   : > { %923 = vmatpush3.bf16.msra.mxu1 %v991_v18 }
  0x19   : > { %924 = vmatprep.subr.bf16.mxu1 %v992_v21 }
  0x1a   : > { %949 = vmatpush3.bf16.msra.mxu0 %v996_v34 }
  0x1b   : > { %950 = vmatprep.subr.bf16.mxu0 %v997_v35 }
  0x1c   : > { %903 = vmatmul.mubr.msk.bf16.gmra.mrb[4].mxu0 %vm212_vm0, %v195_v19  ;;  %925 = vmatpush3.bf16.msra.mxu1 %v992_v21 }
  0x1d   : > { %906 = vmatprep.mubr.msk.bf16.mxu0 %vm212_vm0, %v196_v20  ;;  %926 = vmatprep.subr.bf16.mxu1 %v993_v31 }
  0x1e   : > { %951 = vmatpush3.bf16.msra.mxu0 %v997_v35 }
  0x1f   : > { %952 = vmatprep.subr.bf16.mxu0 %v998_v36 }
  0x20   : > { %927 = vmatpush3.bf16.msra.mxu1 %v993_v31 }
  0x21   : > { %928 = vmatprep.subr.bf16.mxu1 %v994_v32 }
  0x22   : > { %953 = vmatpush3.bf16.msra.mxu0 %v998_v36  ;;  %v1001_v36 = vld [vmem:[%s1180_s1 + $0xb0] sm:$0xff]  }
  0x23   : > { %954 = vmatprep.subr.bf16.mxu0 %v999_v37 }
  0x24   : > { %907 = vmatmul.mubr.msk.bf16.gmra.mrb[8].mxu0 %vm212_vm0, %v197_v26  ;;  %929 = vmatpush3.bf16.msra.mxu1 %v994_v32 }
  0x25   : > { %910 = vmatprep.mubr.msk.bf16.mxu0 %vm212_vm0, %v198_v27 }
  0x26   : > { %955 = vmatpush3.bf16.msra.mxu0 %v999_v37  ;;  %v1002_v37 = vld [vmem:[%s1180_s1 + $0xb8] sm:$0xff]  }
  0x27   : > { %956 = vmatprep.subr.bf16.mxu0 %v1000_v38 }
  0x2a   : > { %957 = vmatpush3.bf16.msra.mxu0 %v1000_v38  ;;  %v377_v38 = vsub.s32 1, %v1118_v40 }
  0x2b   : > { %958 = vmatprep.subr.bf16.mxu0 %v1001_v36 }
  0x2c   : > { %911 = vmatmul.mubr.msk.bf16.gmra.mrb[12].mxu0 %vm212_vm0, %v199_v30  ;;  %v378_v39 = vrot.slane %v1124_v42, %v377_v38 }
  0x2e   : > { %959 = vmatpush3.bf16.msra.mxu0 %v1001_v36 }
  0x2f   : > { %960 = vmatprep.subr.bf16.mxu0 %v1002_v37 }
  0x32   : > { %961 = vmatpush3.bf16.msra.mxu0 %v1002_v37 }
  0xe7   : > { %v900_v44 = vpop.f32.mrb[0].mxu0 }
  0xe8   : > { %v280_v45 = vadd.f32 %v900_v44, %v205_v43  ;;  %v271_v46 = vpop.f32.mrb[1].mxu0 }
  0xe9   : > { %v272_v47 = vadd.f32 %v271_v46, %v205_v43  ;;  %v901_v48 = vpop.f32.mrb[2].mxu0 }
  0xea   : > { %v283_v49 = vadd.f32 %v901_v48, %v205_v43  ;;  %v274_v50 = vpop.f32.mrb[3].mxu0  ;;  %v336_v52 = vmax.f32 %v280_v45, 0.0 }
  0xeb   : > { %v275_v51 = vadd.f32 %v274_v50, %v205_v43  ;;  %v334_v54 = vmax.f32 %v272_v47, 0.0 }
  0xec   : > { %v337_v53 = vmax.f32 %v283_v49, 0.0 }
  0xed   : > { %v335_v55 = vmax.f32 %v275_v51, 0.0 }
  0xee   : > { %v351_v56 = vpack.c.bf16 %v337_v53, %v336_v52 }
  0xef   : > { %v904_v57 = vpop.f32.mrb[4].mxu0  ;;  %v350_v58 = vpack.c.bf16 %v335_v55, %v334_v54 }
  0xf0   : > { %v296_v59 = vadd.f32 %v904_v57, %v205_v43  ;;  %v287_v60 = vpop.f32.mrb[5].mxu0 }
  0xf1   : > { %v288_v61 = vadd.f32 %v287_v60, %v205_v43  ;;  %v905_v62 = vpop.f32.mrb[6].mxu0  ;;  %930 = vmatprep.mubr.bf16.mxu1 %v350_v58 }
  0xf2   : > { %v299_v63 = vadd.f32 %v905_v62, %v205_v43  ;;  %v290_v0 = vpop.f32.mrb[7].mxu0  ;;  %931 = vmatmul.mubr.bf16.vlgmr.msra.gmra.mrb[0].mxu1 %v351_v56  ;;  %v340_v2 = vmax.f32 %v296_v59, 0.0 }
  0xf3   : > { %v291_v1 = vadd.f32 %v290_v0, %v205_v43  ;;  %v338_v4 = vmax.f32 %v288_v61, 0.0 }
  0xf4   : > { %v341_v3 = vmax.f32 %v299_v63, 0.0 }
  0xf5   : > { %v339_v5 = vmax.f32 %v291_v1, 0.0 }
  0xf6   : > { %v353_v6 = vpack.c.bf16 %v341_v3, %v340_v2 }
  0xf7   : > { %v352_v7 = vpack.c.bf16 %v339_v5, %v338_v4  ;;  %v908_v8 = vpop.f32.mrb[8].mxu0 }
  0xf8   : > { %v312_v9 = vadd.f32 %v908_v8, %v205_v43  ;;  %v303_v10 = vpop.f32.mrb[9].mxu0 }
  0xf9   : > { %v304_v11 = vadd.f32 %v303_v10, %v205_v43  ;;  %v909_v12 = vpop.f32.mrb[10].mxu0  ;;  %934 = vmatprep.mubr.bf16.mxu1 %v352_v7 }
  0xfa   : > { %v315_v13 = vadd.f32 %v909_v12, %v205_v43  ;;  %v306_v14 = vpop.f32.mrb[11].mxu0  ;;  %935 = vmatmul.mubr.bf16.gmra.mrb[4].mxu1 %v353_v6  ;;  %v344_v16 = vmax.f32 %v312_v9, 0.0 }
  0xfb   : > { %v307_v15 = vadd.f32 %v306_v14, %v205_v43  ;;  %v342_v18 = vmax.f32 %v304_v11, 0.0 }
  0xfc   : > { %v345_v17 = vmax.f32 %v315_v13, 0.0 }
  0xfd   : > { %v343_v19 = vmax.f32 %v307_v15, 0.0 }
  0xfe   : > { %v355_v20 = vpack.c.bf16 %v345_v17, %v344_v16 }
  0xff   : > { %v354_v21 = vpack.c.bf16 %v343_v19, %v342_v18  ;;  %v912_v22 = vpop.f32.mrb[12].mxu0 }
 0x100   : > { %v328_v23 = vadd.f32 %v912_v22, %v205_v43  ;;  %v319_v24 = vpop.f32.mrb[13].mxu0 }
 0x101   : > { %v320_v25 = vadd.f32 %v319_v24, %v205_v43  ;;  %v913_v26 = vpop.f32.mrb[14].mxu0  ;;  %938 = vmatprep.mubr.bf16.mxu1 %v354_v21 }
 0x102   : > { %v331_v27 = vadd.f32 %v913_v26, %v205_v43  ;;  %v322_v28 = vpop.f32.mrb[15].mxu0  ;;  %939 = vmatmul.mubr.bf16.gmra.mrb[8].mxu1 %v355_v20  ;;  %v348_v30 = vmax.f32 %v328_v23, 0.0 }
 0x103   : > { %v323_v29 = vadd.f32 %v322_v28, %v205_v43  ;;  %v346_v32 = vmax.f32 %v320_v25, 0.0 }
 0x104   : > { %v349_v31 = vmax.f32 %v331_v27, 0.0 }
 0x105   : > { %v347_v33 = vmax.f32 %v323_v29, 0.0 }
 0x106   : > { %v357_v34 = vpack.c.bf16 %v349_v31, %v348_v30 }
 0x107   : > { %v356_v35 = vpack.c.bf16 %v347_v33, %v346_v32 }
 0x109   : > { %942 = vmatprep.mubr.bf16.mxu1 %v356_v35 }
 0x10a   : > { %943 = vmatmul.mubr.bf16.gmra.mrb[12].mxu1 %v357_v34  ;;  %v567_v34 = vsub.s32 2, %v1118_v40 }
 0x10c   : > { %v568_v35 = vrot.slane %v1124_v42, %v567_v34 }
 0x1c5   : > { %v932_v41 = vpop.f32.mrb[0].mxu1 }
 0x1c6   : > { %v470_v43 = vadd.f32 %v932_v41, %v378_v39  ;;  %v461_v44 = vpop.f32.mrb[1].mxu1 }
 0x1c7   : > { %v462_v45 = vadd.f32 %v461_v44, %v378_v39  ;;  %v933_v46 = vpop.f32.mrb[2].mxu1 }
 0x1c8   : > { %v473_v47 = vadd.f32 %v933_v46, %v378_v39  ;;  %v464_v48 = vpop.f32.mrb[3].mxu1  ;;  %v526_v50 = vmax.f32 %v470_v43, 0.0 }
 0x1c9   : > { %v465_v49 = vadd.f32 %v464_v48, %v378_v39  ;;  %v524_v52 = vmax.f32 %v462_v45, 0.0 }
 0x1ca   : > { %v527_v51 = vmax.f32 %v473_v47, 0.0 }
 0x1cb   : > { %v525_v53 = vmax.f32 %v465_v49, 0.0 }
 0x1cc   : > { %v541_v54 = vpack.c.bf16 %v527_v51, %v526_v50 }
 0x1cd   : > { %v540_v55 = vpack.c.bf16 %v525_v53, %v524_v52  ;;  %v936_v56 = vpop.f32.mrb[4].mxu1 }
 0x1ce   : > { %v486_v57 = vadd.f32 %v936_v56, %v378_v39  ;;  %v477_v58 = vpop.f32.mrb[5].mxu1 }
 0x1cf   : > { %v478_v59 = vadd.f32 %v477_v58, %v378_v39  ;;  %v937_v60 = vpop.f32.mrb[6].mxu1  ;;  %962 = vmatprep.mubr.bf16.mxu0 %v540_v55 }
 0x1d0   : > { %v489_v61 = vadd.f32 %v937_v60, %v378_v39  ;;  %v480_v62 = vpop.f32.mrb[7].mxu1  ;;  %963 = vmatmul.mubr.bf16.vlgmr.msra.gmra.mrb[16].mxu0 %v541_v54  ;;  %v530_v0 = vmax.f32 %v486_v57, 0.0 }
 0x1d1   : > { %v481_v63 = vadd.f32 %v480_v62, %v378_v39  ;;  %v528_v2 = vmax.f32 %v478_v59, 0.0 }
 0x1d2   : > { %v531_v1 = vmax.f32 %v489_v61, 0.0 }
 0x1d3   : > { %v529_v3 = vmax.f32 %v481_v63, 0.0 }
 0x1d4   : > { %v543_v4 = vpack.c.bf16 %v531_v1, %v530_v0 }
 0x1d5   : > { %v542_v5 = vpack.c.bf16 %v529_v3, %v528_v2  ;;  %v940_v6 = vpop.f32.mrb[8].mxu1 }
 0x1d6   : > { %v502_v7 = vadd.f32 %v940_v6, %v378_v39  ;;  %v493_v8 = vpop.f32.mrb[9].mxu1 }
 0x1d7   : > { %v494_v9 = vadd.f32 %v493_v8, %v378_v39  ;;  %v941_v10 = vpop.f32.mrb[10].mxu1  ;;  %966 = vmatprep.mubr.bf16.mxu0 %v542_v5 }
 0x1d8   : > { %v505_v11 = vadd.f32 %v941_v10, %v378_v39  ;;  %v496_v12 = vpop.f32.mrb[11].mxu1  ;;  %967 = vmatmul.mubr.bf16.gmra.mrb[20].mxu0 %v543_v4  ;;  %v534_v14 = vmax.f32 %v502_v7, 0.0 }
 0x1d9   : > { %v497_v13 = vadd.f32 %v496_v12, %v378_v39  ;;  %v532_v16 = vmax.f32 %v494_v9, 0.0 }
 0x1da   : > { %v535_v15 = vmax.f32 %v505_v11, 0.0 }
 0x1db   : > { %v533_v17 = vmax.f32 %v497_v13, 0.0 }
 0x1dc   : > { %v545_v18 = vpack.c.bf16 %v535_v15, %v534_v14 }
 0x1dd   : > { %v544_v19 = vpack.c.bf16 %v533_v17, %v532_v16  ;;  %v944_v20 = vpop.f32.mrb[12].mxu1 }
 0x1de   : > { %v518_v21 = vadd.f32 %v944_v20, %v378_v39  ;;  %v509_v22 = vpop.f32.mrb[13].mxu1 }
 0x1df   : > { %v510_v23 = vadd.f32 %v509_v22, %v378_v39  ;;  %v945_v24 = vpop.f32.mrb[14].mxu1  ;;  %970 = vmatprep.mubr.bf16.mxu0 %v544_v19 }
 0x1e0   : > { %v521_v25 = vadd.f32 %v945_v24, %v378_v39  ;;  %v512_v26 = vpop.f32.mrb[15].mxu1  ;;  %971 = vmatmul.mubr.bf16.gmra.mrb[24].mxu0 %v545_v18  ;;  %v538_v28 = vmax.f32 %v518_v21, 0.0 }
 0x1e1   : > { %v513_v27 = vadd.f32 %v512_v26, %v378_v39  ;;  %v536_v30 = vmax.f32 %v510_v23, 0.0 }
 0x1e2   : > { %v539_v29 = vmax.f32 %v521_v25, 0.0 }
 0x1e3   : > { %v537_v31 = vmax.f32 %v513_v27, 0.0 }
 0x1e4   : > { %v547_v32 = vpack.c.bf16 %v539_v29, %v538_v28 }
 0x1e5   : > { %v546_v33 = vpack.c.bf16 %v537_v31, %v536_v30 }
 0x1e7   : > { %974 = vmatprep.mubr.bf16.mxu0 %v546_v33 }
 0x1e8   : > { %975 = vmatmul.mubr.bf16.gmra.mrb[28].mxu0 %v547_v32 }
 0x2a3   : > { %v964_v36 = vpop.f32.mrb[16].mxu0 }
 0x2a4   : > { %v660_v37 = vadd.f32 %v964_v36, %v568_v35  ;;  %v651_v38 = vpop.f32.mrb[17].mxu0 }
 0x2a5   : > { %v652_v39 = vadd.f32 %v651_v38, %v568_v35  ;;  %v965_v41 = vpop.f32.mrb[18].mxu0 }
 0x2a6   : > { %717 = vst.msk [vmem:[%s1142_s6 + $0x10] sm:$0xff] %vm714_vm1, %v660_v37  ;;  %v663_v40 = vadd.f32 %v965_v41, %v568_v35  ;;  %v654_v42 = vpop.f32.mrb[19].mxu0 }
 0x2a7   : > { %715 = vst.msk [vmem:[%s1142_s6] sm:$0xff] %vm714_vm1, %v652_v39  ;;  %v655_v43 = vadd.f32 %v654_v42, %v568_v35 }
 0x2a8   : > { %718 = vst.msk [vmem:[%s1142_s6 + $0x18] sm:$0xff] %vm714_vm1, %v663_v40 }
 0x2a9   : > { %716 = vst.msk [vmem:[%s1142_s6 + $0x8] sm:$0xff] %vm714_vm1, %v655_v43 }
 0x2ab   : > { %v968_v44 = vpop.f32.mrb[20].mxu0 }
 0x2ac   : > { %v676_v45 = vadd.f32 %v968_v44, %v568_v35  ;;  %v667_v46 = vpop.f32.mrb[21].mxu0 }
 0x2ad   : > { %v668_v47 = vadd.f32 %v667_v46, %v568_v35  ;;  %v969_v48 = vpop.f32.mrb[22].mxu0 }
 0x2ae   : > { %721 = vst.msk [vmem:[%s1142_s6 + $0x30] sm:$0xff] %vm714_vm1, %v676_v45  ;;  %v679_v49 = vadd.f32 %v969_v48, %v568_v35  ;;  %v670_v50 = vpop.f32.mrb[23].mxu0 }
 0x2af   : > { %719 = vst.msk [vmem:[%s1142_s6 + $0x20] sm:$0xff] %vm714_vm1, %v668_v47  ;;  %v671_v51 = vadd.f32 %v670_v50, %v568_v35 }
 0x2b0   : > { %722 = vst.msk [vmem:[%s1142_s6 + $0x38] sm:$0xff] %vm714_vm1, %v679_v49 }
 0x2b1   : > { %720 = vst.msk [vmem:[%s1142_s6 + $0x28] sm:$0xff] %vm714_vm1, %v671_v51 }
 0x2b3   : > { %v972_v52 = vpop.f32.mrb[24].mxu0 }
 0x2b4   : > { %v692_v53 = vadd.f32 %v972_v52, %v568_v35  ;;  %v683_v54 = vpop.f32.mrb[25].mxu0 }
 0x2b5   : > { %v684_v55 = vadd.f32 %v683_v54, %v568_v35  ;;  %v973_v56 = vpop.f32.mrb[26].mxu0 }
 0x2b6   : > { %725 = vst.msk [vmem:[%s1142_s6 + $0x50] sm:$0xff] %vm714_vm1, %v692_v53  ;;  %v695_v57 = vadd.f32 %v973_v56, %v568_v35  ;;  %v686_v58 = vpop.f32.mrb[27].mxu0 }
 0x2b7   : > { %723 = vst.msk [vmem:[%s1142_s6 + $0x40] sm:$0xff] %vm714_vm1, %v684_v55  ;;  %v687_v59 = vadd.f32 %v686_v58, %v568_v35 }
 0x2b8   : > { %726 = vst.msk [vmem:[%s1142_s6 + $0x58] sm:$0xff] %vm714_vm1, %v695_v57 }
 0x2b9   : > { %724 = vst.msk [vmem:[%s1142_s6 + $0x48] sm:$0xff] %vm714_vm1, %v687_v59 }
 0x2bb   : > { %v976_v60 = vpop.f32.mrb[28].mxu0 }
 0x2bc   : > { %v708_v61 = vadd.f32 %v976_v60, %v568_v35  ;;  %v699_v62 = vpop.f32.mrb[29].mxu0 }
 0x2bd   : > { %v700_v63 = vadd.f32 %v699_v62, %v568_v35  ;;  %v977_v0 = vpop.f32.mrb[30].mxu0 }
 0x2be   : > { %729 = vst.msk [vmem:[%s1142_s6 + $0x70] sm:$0xff] %vm714_vm1, %v708_v61  ;;  %v711_v1 = vadd.f32 %v977_v0, %v568_v35  ;;  %v702_v2 = vpop.f32.mrb[31].mxu0 }
 0x2bf   : > { %727 = vst.msk [vmem:[%s1142_s6 + $0x60] sm:$0xff] %vm714_vm1, %v700_v63  ;;  %v703_v3 = vadd.f32 %v702_v2, %v568_v35 }
 0x2c0   : > { %730 = vst.msk [vmem:[%s1142_s6 + $0x78] sm:$0xff] %vm714_vm1, %v711_v1 }
 0x2c1   : > { %728 = vst.msk [vmem:[%s1142_s6 + $0x68] sm:$0xff] %vm714_vm1, %v703_v3 }
 0x2c2 PF: > { %s13_s12 = sadd.s32 1, %s1009_s12  }
 0x2c3   : > { %p10_p4 = scmp.ge.s32.totalorder %s13_s12, 4  }
 0x2c5   :  { %12 = sbr.rel (!%p10_p4) target bundleno = 1 (0x1), region = 64 }

</bundles_post_ra>
